<compile_context>
chip_gen: v6e
topology: v6e:2x2x1
jax: 0.10.0
libtpu: 0.0.40
codegen_flags: <defaults>
</compile_context>

<pallas_src>
import functools

import jax
import jax.numpy as jnp
from jax.experimental import pallas as pl
from jax.experimental.pallas import tpu as pltpu

K_IN = 28 * 28            # 784 — un-padded (equals full array dim; MXU masks K)
H, H_PAD = 320, 384       # hidden 320 -> 3*128 (lane-dense)
N_OUT, N_PAD = 10, 128    # logits 10 -> 1*128 (lane-dense output stores)


def _round_up(x, m):
    return (x + m - 1) // m * m


def simpnet_kernel(x_ref, w1_ref, b1_ref, w2_ref, b2_ref, o_ref):
    # x_ref:  [bm, 784]      raw image rows (f32); cast to compute dtype in-kernel
    # w1_ref: [784, H_PAD]   compute dtype, resident across grid steps
    # b1_ref: [1, H_PAD]     f32
    # w2_ref: [H_PAD, N_PAD] compute dtype, resident
    # b2_ref: [1, N_PAD]     f32
    # o_ref:  [bm, N_PAD]    f32 or bf16
    x = x_ref[...].astype(w1_ref.dtype)                      # VPU cast, no HBM pass
    h = jnp.dot(x, w1_ref[...], preferred_element_type=jnp.float32)
    h = jnp.maximum(h + b1_ref[...], 0.0)                    # bias + ReLU in f32
    y = jnp.dot(h.astype(w2_ref.dtype), w2_ref[...],
                preferred_element_type=jnp.float32)
    o_ref[...] = (y + b2_ref[...]).astype(o_ref.dtype)


def prep_params(w1, b1, w2, b2, compute_dtype=jnp.bfloat16):
    """Pad + pre-transpose PyTorch nn.Linear params ONCE (not per forward call).

    w1: (320, 784), b1: (320,), w2: (10, 320), b2: (10,)  — nn.Linear layout.
    Padded b1 entries / w2 rows are zero, so ReLU(0)=0 contributes nothing.
    """
    w1_t = jnp.zeros((K_IN, H_PAD), compute_dtype)
    w1_t = w1_t.at[:, :H].set(w1.T.astype(compute_dtype))
    b1_p = jnp.zeros((1, H_PAD), jnp.float32).at[0, :H].set(b1.astype(jnp.float32))
    w2_t = jnp.zeros((H_PAD, N_PAD), compute_dtype)
    w2_t = w2_t.at[:H, :N_OUT].set(w2.T.astype(compute_dtype))
    b2_p = jnp.zeros((1, N_PAD), jnp.float32).at[0, :N_OUT].set(b2.astype(jnp.float32))
    return w1_t, b1_p, w2_t, b2_p


def _pick_bm(B, block_m):
    """Adaptive batch tile: >=2 grid steps when possible (v7x uses both TCs),
    padded-row waste bounded by one tile, 16-row floor (sublane-legal)."""
    n_steps = max(2, pl.cdiv(B, block_m))
    bm = _round_up(pl.cdiv(B, n_steps), 16)
    return max(16, min(bm, _round_up(block_m, 16)))


@functools.partial(jax.jit, static_argnames=("block_m", "out_dtype"))
def simpnet_forward(img, w1_t, b1_p, w2_t, b2_p, *, block_m=2048,
                    out_dtype=jnp.float32):
    """img: [..., 28, 28] float32. Returns logits [B, 10] in `out_dtype`."""
    x2d = img.reshape(-1, K_IN)                  # == torch .view(-1, 784); free
    B = x2d.shape[0]
    cdt = w1_t.dtype

    bm = _pick_bm(B, block_m)
    Bp = _round_up(B, bm)
    if Bp != B:                                  # only copy when not tile-divisible
        x2d = jnp.pad(x2d, ((0, Bp - B), (0, 0)))
    n_blocks = Bp // bm

    x_itm = jnp.dtype(x2d.dtype).itemsize
    cdt_itm = jnp.dtype(cdt).itemsize
    out_itm = jnp.dtype(out_dtype).itemsize

    flops = 2 * Bp * (K_IN * H_PAD + H_PAD * N_PAD)
    bytes_accessed = (Bp * K_IN * x_itm                       # x (read once, no copies)
                      + (K_IN * H_PAD + H_PAD * N_PAD) * cdt_itm   # weights
                      + (H_PAD + N_PAD) * 4                   # biases
                      + Bp * N_PAD * out_itm)                 # logits

    # VMEM budget (v7x: 64 MiB/TC): double-buffered x & out tiles, f32 hidden,
    # in-kernel cast copies of x/h, weights (assume worst-case 2 buffers).
    vmem_est = (2 * bm * K_IN * x_itm
                + 2 * bm * N_PAD * out_itm
                + bm * (K_IN + H_PAD) * cdt_itm
                + bm * H_PAD * 4
                + 2 * (K_IN * H_PAD + H_PAD * N_PAD) * cdt_itm
                + 2 * (H_PAD + N_PAD) * 4)
    vmem_limit = max(32 * 1024 * 1024,
                     min(vmem_est * 3 // 2, 100 * 1024 * 1024))

    out = pl.pallas_call(
        simpnet_kernel,
        out_shape=jax.ShapeDtypeStruct((Bp, N_PAD), out_dtype),
        grid=(n_blocks,),
        in_specs=[
            pl.BlockSpec((bm, K_IN), lambda i: (i, 0)),       # raw rows, batch-tiled
            pl.BlockSpec((K_IN, H_PAD), lambda i: (0, 0)),    # w1 resident
            pl.BlockSpec((1, H_PAD), lambda i: (0, 0)),       # b1 resident
            pl.BlockSpec((H_PAD, N_PAD), lambda i: (0, 0)),   # w2 resident
            pl.BlockSpec((1, N_PAD), lambda i: (0, 0)),       # b2 resident
        ],
        out_specs=pl.BlockSpec((bm, N_PAD), lambda i: (i, 0)),
        compiler_params=pltpu.CompilerParams(
            dimension_semantics=("parallel",),                # batch axis -> megacore
            vmem_limit_bytes=int(vmem_limit),
        ),
        cost_estimate=pl.CostEstimate(
            flops=int(flops), transcendentals=0,
            bytes_accessed=int(bytes_accessed)),
    )(x2d, w1_t, b1_p, w2_t, b2_p)

    return out[:B, :N_OUT]


def init_params(key):
    """Deterministic init matching nn.Linear shapes (uniform +/- 1/sqrt(fan_in))."""
    k1, k2, k3, k4 = jax.random.split(key, 4)
    lim1 = 1.0 / jnp.sqrt(jnp.float32(K_IN))
    lim2 = 1.0 / jnp.sqrt(jnp.float32(H))
    w1 = jax.random.uniform(k1, (H, K_IN), jnp.float32, -lim1, lim1)   # linear1.weight
    b1 = jax.random.uniform(k2, (H,), jnp.float32, -lim1, lim1)        # linear1.bias
    w2 = jax.random.uniform(k3, (N_OUT, H), jnp.float32, -lim2, lim2)  # out.weight
    b2 = jax.random.uniform(k4, (N_OUT,), jnp.float32, -lim2, lim2)    # out.bias
    return w1, b1, w2, b2


if __name__ == "__main__":
    key = jax.random.PRNGKey(0)
    k_params, k_img = jax.random.split(key)
    w1, b1, w2, b2 = init_params(k_params)

    # Small deterministic batch of MNIST-shaped inputs (NCHW).
    img = jax.random.normal(k_img, (2, 1, 28, 28), jnp.float32)

    # Pure-JAX f32 reference of the forward semantics.
    xf = img.reshape(-1, K_IN)
    ref = jnp.maximum(xf @ w1.T + b1, 0.0) @ w2.T + b2

    # (1) f32 compute path: semantics check (tolerance leaves margin for the
    #     MXU's default f32 matmul precision over K=784).
    p_f32 = prep_params(w1, b1, w2, b2, compute_dtype=jnp.float32)
    logits_f32 = jax.block_until_ready(simpnet_forward(img, *p_f32))
    assert logits_f32.shape == (2, 10)
    assert jnp.allclose(logits_f32, ref, atol=1e-3, rtol=1e-3)

    # (2) fast path: bf16 weights/activations, f32 accumulation, f32 store.
    p_bf16 = prep_params(w1, b1, w2, b2, compute_dtype=jnp.bfloat16)
    logits = jax.block_until_ready(simpnet_forward(img, *p_bf16))
    assert logits.shape == (2, 10)
    assert jnp.allclose(logits, ref, atol=3e-2, rtol=3e-2)

    # (3) optional bf16 logit store (halves writeback on mem-bound v6e/v7x).
    logits_bf16 = jax.block_until_ready(
        simpnet_forward(img, *p_bf16, out_dtype=jnp.bfloat16))
    assert logits_bf16.shape == (2, 10)
    assert jnp.allclose(logits_bf16.astype(jnp.float32), ref, atol=6e-2, rtol=6e-2)

    print("KERNEL_OK")
</pallas_src>

<mosaic_0001>
module attributes {stable_mosaic.version = 11 : i64} {
  func.func @simpnet_kernel(%arg0: i32, %arg1: memref<16x784xf32, #tpu.memory_space<vmem>>, %arg2: memref<784x384xf32, #tpu.memory_space<vmem>>, %arg3: memref<1x384xf32, #tpu.memory_space<vmem>>, %arg4: memref<384x128xf32, #tpu.memory_space<vmem>>, %arg5: memref<1x128xf32, #tpu.memory_space<vmem>>, %arg6: memref<16x128xf32, #tpu.memory_space<vmem>>) attributes {dimension_semantics = [#tpu.dimension_semantics<parallel>], iteration_bounds = array<i64: 1>, scalar_prefetch = 0 : i64, scratch_operands = 0 : i64, tpu.core_type = #tpu.core_type<tc>, window_params = [{transform_indices = @transform_0, window_bounds = array<i64: 16, 784>}, {pipeline_mode = #tpu.pipeline_mode<synchronous>, transform_indices = @transform_1, window_bounds = array<i64: 784, 384>}, {pipeline_mode = #tpu.pipeline_mode<synchronous>, transform_indices = @transform_2, window_bounds = array<i64: 1, 384>}, {pipeline_mode = #tpu.pipeline_mode<synchronous>, transform_indices = @transform_3, window_bounds = array<i64: 384, 128>}, {pipeline_mode = #tpu.pipeline_mode<synchronous>, transform_indices = @transform_4, window_bounds = array<i64: 1, 128>}, {transform_indices = @transform_5, window_bounds = array<i64: 16, 128>}]} {
    %c0 = arith.constant 0 : index
    %c0_0 = arith.constant 0 : index
    %0 = vector.load %arg1[%c0, %c0_0] : memref<16x784xf32, #tpu.memory_space<vmem>>, vector<16x784xf32>
    %c0_1 = arith.constant 0 : index
    %c0_2 = arith.constant 0 : index
    %1 = vector.load %arg2[%c0_1, %c0_2] : memref<784x384xf32, #tpu.memory_space<vmem>>, vector<784x384xf32>
    %cst = arith.constant dense<0.000000e+00> : vector<16x384xf32>
    %2 = tpu.matmul %0, %1, %cst {dimension_numbers = #tpu.dot_dimension_numbers<[1], [0], [0], [1], [0, 0, 1, 1], [], []>} : vector<16x784xf32>, vector<784x384xf32>, vector<16x384xf32> -> vector<16x384xf32>
    %c0_3 = arith.constant 0 : index
    %c0_4 = arith.constant 0 : index
    %3 = vector.load %arg3[%c0_3, %c0_4] : memref<1x384xf32, #tpu.memory_space<vmem>>, vector<1x384xf32>
    %4 = vector.broadcast %3 : vector<1x384xf32> to vector<16x384xf32>
    %5 = arith.addf %2, %4 : vector<16x384xf32>
    %cst_5 = arith.constant 0.000000e+00 : f32
    %6 = vector.broadcast %cst_5 : f32 to vector<16x384xf32>
    %7 = arith.maximumf %5, %6 : vector<16x384xf32>
    %c0_6 = arith.constant 0 : index
    %c0_7 = arith.constant 0 : index
    %8 = vector.load %arg4[%c0_6, %c0_7] : memref<384x128xf32, #tpu.memory_space<vmem>>, vector<384x128xf32>
    %cst_8 = arith.constant dense<0.000000e+00> : vector<16x128xf32>
    %9 = tpu.matmul %7, %8, %cst_8 {dimension_numbers = #tpu.dot_dimension_numbers<[1], [0], [0], [1], [0, 0, 1, 1], [], []>} : vector<16x384xf32>, vector<384x128xf32>, vector<16x128xf32> -> vector<16x128xf32>
    %c0_9 = arith.constant 0 : index
    %c0_10 = arith.constant 0 : index
    %10 = vector.load %arg5[%c0_9, %c0_10] : memref<1x128xf32, #tpu.memory_space<vmem>>, vector<1x128xf32>
    %11 = vector.broadcast %10 : vector<1x128xf32> to vector<16x128xf32>
    %12 = arith.addf %9, %11 : vector<16x128xf32>
    %c0_11 = arith.constant 0 : index
    %c0_12 = arith.constant 0 : index
    %13 = vector.load %arg6[%c0_11, %c0_12] : memref<16x128xf32, #tpu.memory_space<vmem>>, vector<16x128xf32>
    tpu.vector_store %arg6[%c0_11, %c0_12], %12 {strides = array<i32>} : memref<16x128xf32, #tpu.memory_space<vmem>>, vector<16x128xf32>,
    return
  }
  func.func @transform_0(%arg0: i32) -> (i32, i32) {
    %c0_i32 = arith.constant 0 : i32
    %c0_i32_0 = arith.constant 0 : i32
    return %arg0, %c0_i32 : i32, i32
  }
  func.func @transform_1(%arg0: i32) -> (i32, i32) {
    %c0_i32 = arith.constant 0 : i32
    %c0_i32_0 = arith.constant 0 : i32
    %c0_i32_1 = arith.constant 0 : i32
    return %c0_i32, %c0_i32_0 : i32, i32
  }
  func.func @transform_2(%arg0: i32) -> (i32, i32) {
    %c0_i32 = arith.constant 0 : i32
    %c0_i32_0 = arith.constant 0 : i32
    %c0_i32_1 = arith.constant 0 : i32
    return %c0_i32, %c0_i32_0 : i32, i32
  }
  func.func @transform_3(%arg0: i32) -> (i32, i32) {
    %c0_i32 = arith.constant 0 : i32
    %c0_i32_0 = arith.constant 0 : i32
    %c0_i32_1 = arith.constant 0 : i32
    return %c0_i32, %c0_i32_0 : i32, i32
  }
  func.func @transform_4(%arg0: i32) -> (i32, i32) {
    %c0_i32 = arith.constant 0 : i32
    %c0_i32_0 = arith.constant 0 : i32
    %c0_i32_1 = arith.constant 0 : i32
    return %c0_i32, %c0_i32_0 : i32, i32
  }
  func.func @transform_5(%arg0: i32) -> (i32, i32) {
    %c0_i32 = arith.constant 0 : i32
    %c0_i32_0 = arith.constant 0 : i32
    return %arg0, %c0_i32 : i32, i32
  }
}

</mosaic_0001>

<bundles_post_ra>
// kernel: simpnet_forward.1
= control target key start
LH: loop header
LB: loop body
LE: loop exit
PB: predicated region body
PF: predicated region fallthrough
CT: control target
= control target key end

     0   :  { %10 = vsyncpa [#allocation3], 0  ;;  %s1704_s0 = inlined_call_operand.vmem [shape: f32[16,784], index: 0, kind: input, shape index: {}]   ;;  %s1705_s1 = inlined_call_operand.hbm [shape: f32[784,384], index: 1, kind: input, shape index: {}]   ;;  %s1706_s2 = inlined_call_operand.hbm [shape: f32[1,384], index: 2, kind: input, shape index: {}]   ;;  %s1707_s3 = inlined_call_operand.hbm [shape: f32[384,128], index: 3, kind: input, shape index: {}]   ;;  %s1708_s4 = inlined_call_operand.hbm [shape: f32[1,128], index: 4, kind: input, shape index: {}]   ;;  %s1709_s5 = inlined_call_operand.vmem [shape: f32[16,128], index: 5, kind: output, shape index: {}]  }
   0x1   :  { %11 = vsyncpa [#allocation5], 0 }
   0x2   :  { %12 = vsyncpa [#allocation8], 0  ;;  %s1547_s18 = smov [#allocation4]   ;;  %s1548_s20 = smov [#allocation2]  }
   0x3   :  { %s33_s19 = sshll.u32 %s1547_s18, 4  ;;  %s20_s21 = sshll.u32 %s1548_s20, 4  ;;  %s34_s19 = int_to_ptr.vmem [resolvable:$true] %s33_s19  ;;  %s21_s21 = int_to_ptr.vmem [resolvable:$true] %s20_s21 }
   0x4   :  { %s1469_s22 = scalar_lea.vmem %s34_s19, 48  ;;  %s1473_s23 = scalar_lea.vmem %s34_s19, 64 }
   0x5   :  { %p1470_p0 = scmp.ne.s32.totalorder %s34_s19, %s1469_s22  ;;  %p1474_p1 = scmp.lt.s32.totalorder %s34_s19, %s34_s19 }
   0x6   :  { %p1475_p2 = scmp.lt.s32.totalorder %s1473_s23, %s1469_s22 }
   0x8   :  { %p1476_p3 = por %p1475_p2, %p1474_p1 }
   0xa   :  { %p1477_p4 = pnand %p1476_p3, %p1470_p0 }
   0xc   :  { %1480 = shalt.err (!%p1477_p4)
}
   0xd   :  { %36 = dma.hbm_to_vmem [thread:$0]  %s1706_s2, 48, %s34_s19, [#allocation5]  }
   0xe   :  { %s1489_s26 = scalar_lea.vmem %s21_s21, 37632  ;;  %p1494_p6 = scmp.lt.s32.totalorder %s21_s21, %s21_s21 }
   0xf   :  { %p1490_p5 = scmp.ne.s32.totalorder %s21_s21, %s1489_s26  ;;  %p1495_p7 = scmp.lt.s32.totalorder %s1489_s26, %s1489_s26 }
  0x11   :  { %p1496_p8 = por %p1495_p7, %p1494_p6 }
  0x13   :  { %p1497_p9 = pnand %p1496_p8, %p1490_p5 }
  0x15   :  { %1500 = shalt.err (!%p1497_p9)
}
  0x16   :  { %s1549_s27 = smov 384   ;;  %s1550_s28 = smov 24  }
  0x17   :  { %26 = dma.hbm_to_vmem [thread:$0]  %s1705_s1, 37632, %s21_s21, [#allocation3], %s1549_s27, %s1549_s27, %s1550_s28  }
  0x18   :  { %s1551_s6 = smov [#allocation6]  }
  0x19   :  { %s42_s7 = sshll.u32 %s1551_s6, 4  ;;  %s43_s7 = int_to_ptr.vmem [resolvable:$true] %s42_s7 }
  0x1a   :  { %s1509_s8 = scalar_lea.vmem %s43_s7, 6144  ;;  %p1514_p11 = scmp.lt.s32.totalorder %s43_s7, %s43_s7 }
  0x1b   :  { %p1510_p10 = scmp.ne.s32.totalorder %s43_s7, %s1509_s8  ;;  %p1515_p12 = scmp.lt.s32.totalorder %s1509_s8, %s1509_s8 }
  0x1d   :  { %p1516_p13 = por %p1515_p12, %p1514_p11 }
  0x1f   :  { %p1517_p0 = pnand %p1516_p13, %p1510_p10 }
  0x21   :  { %1520 = shalt.err (!%p1517_p0)
}
  0x22   :  { %s1552_s2 = smov 128   ;;  %s1553_s9 = smov 8  }
  0x23   :  { %48 = dma.hbm_to_vmem [thread:$0]  %s1707_s3, 6144, %s43_s7, [#allocation5], %s1552_s2, %s1552_s2, %s1553_s9  }
  0x24   :  { %s1554_s12 = smov [#allocation7]  }
  0x25   :  { %s55_s13 = sshll.u32 %s1554_s12, 4  ;;  %s56_s13 = int_to_ptr.vmem [resolvable:$true] %s55_s13 }
  0x26   :  { %s1529_s1 = scalar_lea.vmem %s56_s13, 16  ;;  %s1533_s14 = scalar_lea.vmem %s56_s13, 32 }
  0x27   :  { %p1530_p1 = scmp.ne.s32.totalorder %s56_s13, %s1529_s1  ;;  %p1534_p2 = scmp.lt.s32.totalorder %s56_s13, %s56_s13 }
  0x28   :  { %p1535_p3 = scmp.lt.s32.totalorder %s1533_s14, %s1529_s1 }
  0x2a   :  { %p1536_p4 = por %p1535_p3, %p1534_p2 }
  0x2c   :  { %p1537_p5 = pnand %p1536_p4, %p1530_p1 }
  0x2e   :  { %1540 = shalt.err (!%p1537_p5)
}
  0x2f   :  { %58 = dma.hbm_to_vmem [thread:$0]  %s1708_s4, 16, %s56_s13, [#allocation8]  }
  0x30   :  { %1541 = dma.done.wait [#allocation3], 37632  }
  0x31   :  { %1542 = vsyncadd [#allocation3], 4294929664 }
  0x32   :  { %1543 = dma.done.wait [#allocation5], 6192  }
  0x33   :  { %1544 = vsyncadd [#allocation5], 4294961104 }
  0x34   :  { %1545 = dma.done.wait [#allocation8], 16  }
  0x35   :  { %1546 = vsyncadd [#allocation8], 4294967280  ;;  %v131_v0 = vld [vmem:[#allocation2 + $0x170] sm:$0xff]  ;;  %v130_v2 = vld [vmem:[#allocation2 + $0x168] sm:$0xff]  ;;  %vm396_vm0 = vcmask 130048  }
  0x36   :  { %v227_v1 = vld [vmem:[#allocation2 + $0x470] sm:$0xff]  ;;  %403 = vmatprep.subr.mxu0 %v131_v0  ;;  %v226_v3 = vld [vmem:[#allocation2 + $0x468] sm:$0xff]  ;;  %v128_v4 = vld [vmem:[#allocation2 + $0x158] sm:$0xff] }
  0x37   :  { %480 = vmatprep.subr.mxu1 %v227_v1  ;;  %v224_v5 = vld [vmem:[#allocation2 + $0x458] sm:$0xff]  ;;  %404 = vmatpush1.msra.mxu0 %v130_v2  ;;  %v127_v6 = vld [vmem:[#allocation2 + $0x150] sm:$0xff]  ;;  %v125_v8 = vld [vmem:[#allocation2 + $0x140] sm:$0xff] }
  0x38   :  { %481 = vmatpush1.msra.mxu1 %v226_v3  ;;  %v223_v7 = vld [vmem:[#allocation2 + $0x450] sm:$0xff]  ;;  %405 = vmatprep.subr.mxu0 %v128_v4  ;;  %v221_v9 = vld [vmem:[#allocation2 + $0x440] sm:$0xff]  ;;  %v124_v10 = vld [vmem:[#allocation2 + $0x138] sm:$0xff] }
  0x39   :  { %482 = vmatprep.subr.mxu1 %v224_v5  ;;  %v220_v11 = vld [vmem:[#allocation2 + $0x438] sm:$0xff]  ;;  %406 = vmatpush1.msra.mxu0 %v127_v6  ;;  %v122_v12 = vld [vmem:[#allocation2 + $0x128] sm:$0xff]  ;;  %v121_v14 = vld [vmem:[#allocation2 + $0x120] sm:$0xff] }
  0x3a   :  { %483 = vmatpush1.msra.mxu1 %v223_v7  ;;  %v218_v13 = vld [vmem:[#allocation2 + $0x428] sm:$0xff]  ;;  %407 = vmatprep.subr.mxu0 %v125_v8  ;;  %v217_v15 = vld [vmem:[#allocation2 + $0x420] sm:$0xff]  ;;  %v119_v16 = vld [vmem:[#allocation2 + $0x110] sm:$0xff] }
  0x3b   :  { %484 = vmatprep.subr.mxu1 %v221_v9  ;;  %408 = vmatpush1.msra.mxu0 %v124_v10  ;;  %v215_v17 = vld [vmem:[#allocation2 + $0x410] sm:$0xff]  ;;  %v118_v18 = vld [vmem:[#allocation2 + $0x108] sm:$0xff]  ;;  %v116_v20 = vld [vmem:[#allocation2 + $0xf8] sm:$0xff] }
  0x3c   :  { %485 = vmatpush1.msra.mxu1 %v220_v11  ;;  %409 = vmatprep.subr.mxu0 %v122_v12  ;;  %v214_v19 = vld [vmem:[#allocation2 + $0x408] sm:$0xff]  ;;  %v212_v21 = vld [vmem:[#allocation2 + $0x3f8] sm:$0xff]  ;;  %v115_v22 = vld [vmem:[#allocation2 + $0xf0] sm:$0xff] }
  0x3d   :  { %486 = vmatprep.subr.mxu1 %v218_v13  ;;  %410 = vmatpush1.msra.mxu0 %v121_v14  ;;  %v211_v23 = vld [vmem:[#allocation2 + $0x3f0] sm:$0xff]  ;;  %v113_v24 = vld [vmem:[#allocation2 + $0xe0] sm:$0xff]  ;;  %v112_v26 = vld [vmem:[#allocation2 + $0xd8] sm:$0xff] }
  0x3e   :  { %487 = vmatpush1.msra.mxu1 %v217_v15  ;;  %411 = vmatprep.subr.mxu0 %v119_v16  ;;  %v209_v25 = vld [vmem:[#allocation2 + $0x3e0] sm:$0xff]  ;;  %v208_v27 = vld [vmem:[#allocation2 + $0x3d8] sm:$0xff]  ;;  %v110_v28 = vld [vmem:[#allocation2 + $0xc8] sm:$0xff] }
  0x3f   :  { %488 = vmatprep.subr.mxu1 %v215_v17  ;;  %412 = vmatpush1.msra.mxu0 %v118_v18  ;;  %v206_v29 = vld [vmem:[#allocation2 + $0x3c8] sm:$0xff]  ;;  %v109_v30 = vld [vmem:[#allocation2 + $0xc0] sm:$0xff]  ;;  %v107_v32 = vld [vmem:[#allocation2 + $0xb0] sm:$0xff] }
  0x40   :  { %489 = vmatpush1.msra.mxu1 %v214_v19  ;;  %413 = vmatprep.subr.mxu0 %v116_v20  ;;  %v205_v31 = vld [vmem:[#allocation2 + $0x3c0] sm:$0xff]  ;;  %v203_v33 = vld [vmem:[#allocation2 + $0x3b0] sm:$0xff]  ;;  %v106_v34 = vld [vmem:[#allocation2 + $0xa8] sm:$0xff] }
  0x41   :  { %490 = vmatprep.subr.mxu1 %v212_v21  ;;  %414 = vmatpush1.msra.mxu0 %v115_v22  ;;  %v202_v35 = vld [vmem:[#allocation2 + $0x3a8] sm:$0xff]  ;;  %v104_v36 = vld [vmem:[#allocation2 + $0x98] sm:$0xff]  ;;  %v103_v38 = vld [vmem:[#allocation2 + $0x90] sm:$0xff] }
  0x42   :  { %491 = vmatpush1.msra.mxu1 %v211_v23  ;;  %415 = vmatprep.subr.mxu0 %v113_v24  ;;  %v200_v37 = vld [vmem:[#allocation2 + $0x398] sm:$0xff]  ;;  %v199_v39 = vld [vmem:[#allocation2 + $0x390] sm:$0xff]  ;;  %v101_v40 = vld [vmem:[#allocation2 + $0x80] sm:$0xff] }
  0x43   :  { %492 = vmatprep.subr.mxu1 %v209_v25  ;;  %416 = vmatpush1.msra.mxu0 %v112_v26  ;;  %v197_v41 = vld [vmem:[#allocation2 + $0x380] sm:$0xff]  ;;  %v100_v42 = vld [vmem:[#allocation2 + $0x78] sm:$0xff]  ;;  %v98_v44 = vld [vmem:[#allocation2 + $0x68] sm:$0xff] }
  0x44   :  { %493 = vmatpush1.msra.mxu1 %v208_v27  ;;  %417 = vmatprep.subr.mxu0 %v110_v28  ;;  %v196_v43 = vld [vmem:[#allocation2 + $0x378] sm:$0xff]  ;;  %v194_v45 = vld [vmem:[#allocation2 + $0x368] sm:$0xff]  ;;  %v97_v46 = vld [vmem:[#allocation2 + $0x60] sm:$0xff] }
  0x45   :  { %494 = vmatprep.subr.mxu1 %v206_v29  ;;  %418 = vmatpush1.msra.mxu0 %v109_v30  ;;  %v193_v47 = vld [vmem:[#allocation2 + $0x360] sm:$0xff]  ;;  %v95_v48 = vld [vmem:[#allocation2 + $0x50] sm:$0xff]  ;;  %v94_v50 = vld [vmem:[#allocation2 + $0x48] sm:$0xff] }
  0x46   :  { %495 = vmatpush1.msra.mxu1 %v205_v31  ;;  %419 = vmatprep.subr.mxu0 %v107_v32  ;;  %v191_v49 = vld [vmem:[#allocation2 + $0x350] sm:$0xff]  ;;  %v190_v51 = vld [vmem:[#allocation2 + $0x348] sm:$0xff]  ;;  %v92_v52 = vld [vmem:[#allocation2 + $0x38] sm:$0xff] }
  0x47   :  { %496 = vmatprep.subr.mxu1 %v203_v33  ;;  %420 = vmatpush1.msra.mxu0 %v106_v34  ;;  %v188_v53 = vld [vmem:[#allocation2 + $0x338] sm:$0xff]  ;;  %v91_v54 = vld [vmem:[#allocation2 + $0x30] sm:$0xff]  ;;  %v89_v56 = vld [vmem:[#allocation2 + $0x20] sm:$0xff] }
  0x48   :  { %497 = vmatpush1.msra.mxu1 %v202_v35  ;;  %421 = vmatprep.subr.mxu0 %v104_v36  ;;  %v187_v55 = vld [vmem:[#allocation2 + $0x330] sm:$0xff]  ;;  %v185_v57 = vld [vmem:[#allocation2 + $0x320] sm:$0xff]  ;;  %v88_v58 = vld [vmem:[#allocation2 + $0x18] sm:$0xff] }
  0x49   :  { %498 = vmatprep.subr.mxu1 %v200_v37  ;;  %422 = vmatpush1.msra.mxu0 %v103_v38  ;;  %v184_v59 = vld [vmem:[#allocation2 + $0x318] sm:$0xff]  ;;  %v86_v60 = vld [vmem:[#allocation2 + $0x8] sm:$0xff]  ;;  %v85_v62 = vld [vmem:[#allocation2] sm:$0xff] }
  0x4a   :  { %499 = vmatpush1.msra.mxu1 %v199_v39  ;;  %423 = vmatprep.subr.mxu0 %v101_v40  ;;  %v182_v61 = vld [vmem:[#allocation2 + $0x308] sm:$0xff]  ;;  %v181_v63 = vld [vmem:[#allocation2 + $0x300] sm:$0xff]  ;;  %v179_v0 = vld [vmem:[#allocation2 + $0x2f0] sm:$0xff] }
  0x4b   :  { %500 = vmatprep.subr.mxu1 %v197_v41  ;;  %424 = vmatpush1.msra.mxu0 %v100_v42  ;;  %v275_v1 = vld [vmem:[#allocation2 + $0x5f0] sm:$0xff]  ;;  %v178_v2 = vld [vmem:[#allocation2 + $0x2e8] sm:$0xff]  ;;  %v176_v4 = vld [vmem:[#allocation2 + $0x2d8] sm:$0xff] }
  0x4c   :  { %501 = vmatpush1.msra.mxu1 %v196_v43  ;;  %425 = vmatprep.subr.mxu0 %v98_v44  ;;  %v274_v3 = vld [vmem:[#allocation2 + $0x5e8] sm:$0xff]  ;;  %v272_v5 = vld [vmem:[#allocation2 + $0x5d8] sm:$0xff]  ;;  %v175_v6 = vld [vmem:[#allocation2 + $0x2d0] sm:$0xff] }
  0x4d   :  { %502 = vmatprep.subr.mxu1 %v194_v45  ;;  %426 = vmatpush1.msra.mxu0 %v97_v46  ;;  %v271_v7 = vld [vmem:[#allocation2 + $0x5d0] sm:$0xff]  ;;  %v173_v8 = vld [vmem:[#allocation2 + $0x2c0] sm:$0xff]  ;;  %v172_v10 = vld [vmem:[#allocation2 + $0x2b8] sm:$0xff] }
  0x4e   :  { %503 = vmatpush1.msra.mxu1 %v193_v47  ;;  %427 = vmatprep.subr.mxu0 %v95_v48  ;;  %v269_v9 = vld [vmem:[#allocation2 + $0x5c0] sm:$0xff]  ;;  %v268_v11 = vld [vmem:[#allocation2 + $0x5b8] sm:$0xff]  ;;  %v170_v12 = vld [vmem:[#allocation2 + $0x2a8] sm:$0xff] }
  0x4f   :  { %504 = vmatprep.subr.mxu1 %v191_v49  ;;  %428 = vmatpush1.msra.mxu0 %v94_v50  ;;  %v266_v13 = vld [vmem:[#allocation2 + $0x5a8] sm:$0xff]  ;;  %v169_v14 = vld [vmem:[#allocation2 + $0x2a0] sm:$0xff]  ;;  %v167_v16 = vld [vmem:[#allocation2 + $0x290] sm:$0xff] }
  0x50   :  { %505 = vmatpush1.msra.mxu1 %v190_v51  ;;  %429 = vmatprep.subr.mxu0 %v92_v52  ;;  %v265_v15 = vld [vmem:[#allocation2 + $0x5a0] sm:$0xff]  ;;  %v263_v17 = vld [vmem:[#allocation2 + $0x590] sm:$0xff]  ;;  %v166_v18 = vld [vmem:[#allocation2 + $0x288] sm:$0xff] }
  0x51   :  { %506 = vmatprep.subr.mxu1 %v188_v53  ;;  %430 = vmatpush1.msra.mxu0 %v91_v54  ;;  %v262_v19 = vld [vmem:[#allocation2 + $0x588] sm:$0xff]  ;;  %v164_v20 = vld [vmem:[#allocation2 + $0x278] sm:$0xff]  ;;  %v163_v22 = vld [vmem:[#allocation2 + $0x270] sm:$0xff] }
  0x52   :  { %507 = vmatpush1.msra.mxu1 %v187_v55  ;;  %431 = vmatprep.subr.mxu0 %v89_v56  ;;  %v260_v21 = vld [vmem:[#allocation2 + $0x578] sm:$0xff]  ;;  %v259_v23 = vld [vmem:[#allocation2 + $0x570] sm:$0xff]  ;;  %v161_v24 = vld [vmem:[#allocation2 + $0x260] sm:$0xff] }
  0x53   :  { %508 = vmatprep.subr.mxu1 %v185_v57  ;;  %432 = vmatpush1.msra.mxu0 %v88_v58  ;;  %v257_v25 = vld [vmem:[#allocation2 + $0x560] sm:$0xff]  ;;  %v160_v26 = vld [vmem:[#allocation2 + $0x258] sm:$0xff]  ;;  %v158_v28 = vld [vmem:[#allocation2 + $0x248] sm:$0xff] }
  0x54   :  { %509 = vmatpush1.msra.mxu1 %v184_v59  ;;  %433 = vmatprep.subr.mxu0 %v86_v60  ;;  %v256_v27 = vld [vmem:[#allocation2 + $0x558] sm:$0xff]  ;;  %v254_v29 = vld [vmem:[#allocation2 + $0x548] sm:$0xff]  ;;  %v157_v30 = vld [vmem:[#allocation2 + $0x240] sm:$0xff] }
  0x55   :  { %510 = vmatprep.subr.mxu1 %v182_v61  ;;  %434 = vmatpush1.msra.mxu0 %v85_v62  ;;  %v253_v31 = vld [vmem:[#allocation2 + $0x540] sm:$0xff]  ;;  %v155_v32 = vld [vmem:[#allocation2 + $0x230] sm:$0xff]  ;;  %v154_v34 = vld [vmem:[#allocation2 + $0x228] sm:$0xff] }
  0x56   :  { %511 = vmatpush1.msra.mxu1 %v181_v63  ;;  %435 = vmatprep.subr.mxu0 %v179_v0  ;;  %v251_v33 = vld [vmem:[#allocation2 + $0x530] sm:$0xff]  ;;  %v250_v35 = vld [vmem:[#allocation2 + $0x528] sm:$0xff]  ;;  %v152_v36 = vld [vmem:[#allocation2 + $0x218] sm:$0xff] }
  0x57   :  { %512 = vmatprep.subr.mxu1 %v275_v1  ;;  %436 = vmatpush2.msra.mxu0 %v178_v2  ;;  %v248_v37 = vld [vmem:[#allocation2 + $0x518] sm:$0xff]  ;;  %v151_v38 = vld [vmem:[#allocation2 + $0x210] sm:$0xff]  ;;  %v149_v40 = vld [vmem:[#allocation2 + $0x200] sm:$0xff] }
  0x58   :  { %513 = vmatpush2.msra.mxu1 %v274_v3  ;;  %437 = vmatprep.subr.mxu0 %v176_v4  ;;  %v247_v39 = vld [vmem:[#allocation2 + $0x510] sm:$0xff]  ;;  %v245_v41 = vld [vmem:[#allocation2 + $0x500] sm:$0xff]  ;;  %v148_v42 = vld [vmem:[#allocation2 + $0x1f8] sm:$0xff] }
  0x59   :  { %514 = vmatprep.subr.mxu1 %v272_v5  ;;  %438 = vmatpush2.msra.mxu0 %v175_v6  ;;  %v244_v43 = vld [vmem:[#allocation2 + $0x4f8] sm:$0xff]  ;;  %v146_v44 = vld [vmem:[#allocation2 + $0x1e8] sm:$0xff]  ;;  %v145_v46 = vld [vmem:[#allocation2 + $0x1e0] sm:$0xff] }
  0x5a   :  { %515 = vmatpush2.msra.mxu1 %v271_v7  ;;  %439 = vmatprep.subr.mxu0 %v173_v8  ;;  %v242_v45 = vld [vmem:[#allocation2 + $0x4e8] sm:$0xff]  ;;  %v241_v47 = vld [vmem:[#allocation2 + $0x4e0] sm:$0xff]  ;;  %v143_v48 = vld [vmem:[#allocation2 + $0x1d0] sm:$0xff] }
  0x5b   :  { %516 = vmatprep.subr.mxu1 %v269_v9  ;;  %440 = vmatpush2.msra.mxu0 %v172_v10  ;;  %v239_v49 = vld [vmem:[#allocation2 + $0x4d0] sm:$0xff]  ;;  %v142_v50 = vld [vmem:[#allocation2 + $0x1c8] sm:$0xff]  ;;  %v140_v52 = vld [vmem:[#allocation2 + $0x1b8] sm:$0xff] }
  0x5c   :  { %517 = vmatpush2.msra.mxu1 %v268_v11  ;;  %441 = vmatprep.subr.mxu0 %v170_v12  ;;  %v238_v51 = vld [vmem:[#allocation2 + $0x4c8] sm:$0xff]  ;;  %v236_v53 = vld [vmem:[#allocation2 + $0x4b8] sm:$0xff]  ;;  %v139_v54 = vld [vmem:[#allocation2 + $0x1b0] sm:$0xff] }
  0x5d   :  { %518 = vmatprep.subr.mxu1 %v266_v13  ;;  %442 = vmatpush2.msra.mxu0 %v169_v14  ;;  %v235_v55 = vld [vmem:[#allocation2 + $0x4b0] sm:$0xff]  ;;  %v137_v56 = vld [vmem:[#allocation2 + $0x1a0] sm:$0xff]  ;;  %v136_v58 = vld [vmem:[#allocation2 + $0x198] sm:$0xff] }
  0x5e   :  { %519 = vmatpush2.msra.mxu1 %v265_v15  ;;  %443 = vmatprep.subr.mxu0 %v167_v16  ;;  %v233_v57 = vld [vmem:[#allocation2 + $0x4a0] sm:$0xff]  ;;  %v232_v59 = vld [vmem:[#allocation2 + $0x498] sm:$0xff]  ;;  %v134_v60 = vld [vmem:[#allocation2 + $0x188] sm:$0xff] }
  0x5f   :  { %520 = vmatprep.subr.mxu1 %v263_v17  ;;  %444 = vmatpush2.msra.mxu0 %v166_v18  ;;  %v230_v61 = vld [vmem:[#allocation2 + $0x488] sm:$0xff]  ;;  %v133_v62 = vld [vmem:[#allocation2 + $0x180] sm:$0xff]  ;;  %v1606_v1 = vld [vmem:[%s1704_s0 + $0x18] sm:$0xff] }
  0x60   :  { %521 = vmatpush2.msra.mxu1 %v262_v19  ;;  %445 = vmatprep.subr.mxu0 %v164_v20  ;;  %v1601_v63 = vld [vmem:[%s1704_s0 + $0x8] sm:$0xff]  ;;  %v229_v0 = vld [vmem:[#allocation2 + $0x480] sm:$0xff]  ;;  %v1616_v3 = vld [vmem:[%s1704_s0 + $0x10] sm:$0xff] }
  0x61   :  { %522 = vmatprep.subr.mxu1 %v260_v21  ;;  %446 = vmatpush2.msra.mxu0 %v163_v22  ;;  %v1611_v2 = vld [vmem:[%s1704_s0] sm:$0xff]  ;;  %v323_v4 = vld [vmem:[#allocation2 + $0x770] sm:$0xff]  ;;  %v322_v6 = vld [vmem:[#allocation2 + $0x768] sm:$0xff]  ;;  %v1555_v21 = vmov 0.0  }
  0x62   :  { %523 = vmatpush2.msra.mxu1 %v259_v23  ;;  %447 = vmatprep.subr.mxu0 %v161_v24  ;;  %v1622_v5 = vld [vmem:[%s1704_s0 + $0x50] sm:$0xff]  ;;  %v377_v7 = vld [vmem:[#allocation2 + $0x920] sm:$0xff]  ;;  %v320_v8 = vld [vmem:[#allocation2 + $0x758] sm:$0xff] }
  0x63   :  { %524 = vmatprep.subr.mxu1 %v257_v25  ;;  %448 = vmatpush2.msra.mxu0 %v160_v26  ;;  %v376_v9 = vld [vmem:[#allocation2 + $0x918] sm:$0xff]  ;;  %v319_v10 = vld [vmem:[#allocation2 + $0x750] sm:$0xff]  ;;  %v1631_v11 = vld [vmem:[%s1704_s0 + $0x48] sm:$0xff] }
  0x64   :  { %525 = vmatpush2.msra.mxu1 %v256_v27  ;;  %449 = vmatprep.subr.mxu0 %v158_v28  ;;  %v317_v12 = vld [vmem:[#allocation2 + $0x740] sm:$0xff]  ;;  %v374_v13 = vld [vmem:[#allocation2 + $0x908] sm:$0xff]  ;;  %v316_v14 = vld [vmem:[#allocation2 + $0x738] sm:$0xff] }
  0x65   :  { %526 = vmatprep.subr.mxu1 %v254_v29  ;;  %450 = vmatpush2.msra.mxu0 %v157_v30  ;;  %v373_v15 = vld [vmem:[#allocation2 + $0x900] sm:$0xff]  ;;  %v314_v16 = vld [vmem:[#allocation2 + $0x728] sm:$0xff]  ;;  %v180_v18 = vld [vmem:[#allocation2 + $0x2f8] sm:$0xff] }
  0x66   :  { %527 = vmatpush2.msra.mxu1 %v253_v31  ;;  %451 = vmatprep.subr.mxu0 %v155_v32  ;;  %v313_v17 = vld [vmem:[#allocation2 + $0x720] sm:$0xff]  ;;  %v311_v19 = vld [vmem:[#allocation2 + $0x710] sm:$0xff]  ;;  %v132_v22 = vld [vmem:[#allocation2 + $0x178] sm:$0xff] }
  0x67   :  { %528 = vmatprep.subr.mxu1 %v251_v33  ;;  %452 = vmatpush2.msra.mxu0 %v154_v34  ;;  %v1637_v20 = vld [vmem:[%s1704_s0 + $0x30] sm:$0xff]  ;;  %v310_v23 = vld [vmem:[#allocation2 + $0x708] sm:$0xff]  ;;  %v177_v24 = vld [vmem:[#allocation2 + $0x2e0] sm:$0xff] }
  0x68   :  { %529 = vmatpush2.msra.mxu1 %v250_v35  ;;  %453 = vmatprep.subr.mxu0 %v152_v36  ;;  %v308_v25 = vld [vmem:[#allocation2 + $0x6f8] sm:$0xff]  ;;  %v129_v26 = vld [vmem:[#allocation2 + $0x160] sm:$0xff]  ;;  %v307_v27 = vld [vmem:[#allocation2 + $0x6f0] sm:$0xff] }
  0x69   :  { %530 = vmatprep.subr.mxu1 %v248_v37  ;;  %454 = vmatpush2.msra.mxu0 %v151_v38  ;;  %v174_v28 = vld [vmem:[#allocation2 + $0x2c8] sm:$0xff]  ;;  %v305_v29 = vld [vmem:[#allocation2 + $0x6e0] sm:$0xff]  ;;  %v304_v31 = vld [vmem:[#allocation2 + $0x6d8] sm:$0xff] }
  0x6a   :  { %531 = vmatpush2.msra.mxu1 %v247_v39  ;;  %455 = vmatprep.subr.mxu0 %v149_v40  ;;  %v126_v30 = vld [vmem:[#allocation2 + $0x148] sm:$0xff]  ;;  %v171_v32 = vld [vmem:[#allocation2 + $0x2b0] sm:$0xff]  ;;  %v301_v35 = vld [vmem:[#allocation2 + $0x6c0] sm:$0xff] }
  0x6b   :  { %532 = vmatprep.subr.mxu1 %v245_v41  ;;  %456 = vmatpush2.msra.mxu0 %v148_v42  ;;  %v302_v33 = vld [vmem:[#allocation2 + $0x6c8] sm:$0xff]  ;;  %v123_v34 = vld [vmem:[#allocation2 + $0x130] sm:$0xff]  ;;  %v168_v36 = vld [vmem:[#allocation2 + $0x298] sm:$0xff] }
  0x6c   :  { %533 = vmatpush2.msra.mxu1 %v244_v43  ;;  %457 = vmatprep.subr.mxu0 %v146_v44  ;;  %v299_v37 = vld [vmem:[#allocation2 + $0x6b0] sm:$0xff]  ;;  %v120_v38 = vld [vmem:[#allocation2 + $0x118] sm:$0xff]  ;;  %v298_v39 = vld [vmem:[#allocation2 + $0x6a8] sm:$0xff] }
  0x6d   :  { %534 = vmatprep.subr.mxu1 %v242_v45  ;;  %458 = vmatpush2.msra.mxu0 %v145_v46  ;;  %v165_v40 = vld [vmem:[#allocation2 + $0x280] sm:$0xff]  ;;  %v296_v41 = vld [vmem:[#allocation2 + $0x698] sm:$0xff]  ;;  %v295_v43 = vld [vmem:[#allocation2 + $0x690] sm:$0xff] }
  0x6e   :  { %535 = vmatpush2.msra.mxu1 %v241_v47  ;;  %459 = vmatprep.subr.mxu0 %v143_v48  ;;  %v117_v42 = vld [vmem:[#allocation2 + $0x100] sm:$0xff]  ;;  %v162_v44 = vld [vmem:[#allocation2 + $0x268] sm:$0xff]  ;;  %v292_v47 = vld [vmem:[#allocation2 + $0x678] sm:$0xff] }
  0x6f   :  { %536 = vmatprep.subr.mxu1 %v239_v49  ;;  %460 = vmatpush2.msra.mxu0 %v142_v50  ;;  %v293_v45 = vld [vmem:[#allocation2 + $0x680] sm:$0xff]  ;;  %v114_v46 = vld [vmem:[#allocation2 + $0xe8] sm:$0xff]  ;;  %v159_v48 = vld [vmem:[#allocation2 + $0x250] sm:$0xff] }
  0x70   :  { %537 = vmatpush2.msra.mxu1 %v238_v51  ;;  %461 = vmatprep.subr.mxu0 %v140_v52  ;;  %v1645_v49 = vld [vmem:[%s1704_s0 + $0x40] sm:$0xff]  ;;  %v290_v50 = vld [vmem:[#allocation2 + $0x668] sm:$0xff]  ;;  %v111_v51 = vld [vmem:[#allocation2 + $0xd0] sm:$0xff] }
  0x71   :  { %538 = vmatprep.subr.mxu1 %v236_v53  ;;  %462 = vmatpush2.msra.mxu0 %v139_v54  ;;  %v1650_v52 = vld [vmem:[%s1704_s0 + $0x38] sm:$0xff]  ;;  %v289_v54 = vld [vmem:[#allocation2 + $0x660] sm:$0xff] }
  0x72   :  { %539 = vmatpush2.msra.mxu1 %v235_v55  ;;  %463 = vmatprep.subr.mxu0 %v137_v56  ;;  %v156_v53 = vld [vmem:[#allocation2 + $0x238] sm:$0xff]  ;;  %v287_v56 = vld [vmem:[#allocation2 + $0x650] sm:$0xff] }
  0x73   :  { %540 = vmatprep.subr.mxu1 %v233_v57  ;;  %464 = vmatpush2.msra.mxu0 %v136_v58  ;;  %v108_v55 = vld [vmem:[#allocation2 + $0xb8] sm:$0xff]  ;;  %v153_v57 = vld [vmem:[#allocation2 + $0x220] sm:$0xff]  ;;  %v286_v58 = vld [vmem:[#allocation2 + $0x648] sm:$0xff] }
  0x74   :  { %541 = vmatpush2.msra.mxu1 %v232_v59  ;;  %465 = vmatprep.subr.mxu0 %v134_v60  ;;  %v105_v59 = vld [vmem:[#allocation2 + $0xa0] sm:$0xff]  ;;  %v284_v60 = vld [vmem:[#allocation2 + $0x638] sm:$0xff] }
  0x75   :  { %542 = vmatprep.subr.mxu1 %v230_v61  ;;  %466 = vmatpush2.msra.mxu0 %v133_v62  ;;  %v150_v61 = vld [vmem:[#allocation2 + $0x208] sm:$0xff]  ;;  %v283_v62 = vld [vmem:[#allocation2 + $0x630] sm:$0xff] }
  0x76   :  { %467 = vmatprep.mubr.f32.mxu0 %v1601_v63  ;;  %543 = vmatpush2.msra.mxu1 %v229_v0  ;;  %v102_v0 = vld [vmem:[#allocation2 + $0x88] sm:$0xff] }
  0x77   :  { %544 = vmatprep.mubr.f32.mxu1 %v1606_v1  ;;  %468 = vmatmul.mubr.f32.vlgmr.msra.gmra.mxu0 %v1611_v2 }
  0x78   :  { %545 = vmatmul.mubr.f32.vlgmr.msra.gmra.mxu1 %v1616_v3  ;;  %557 = vmatprep.subr.mxu0 %v323_v4  ;;  %v281_v4 = vld [vmem:[#allocation2 + $0x620] sm:$0xff] }
  0x79   :  { %550 = vmatprep.mubr.f32.mxu1 %v1622_v5  ;;  %558 = vmatpush1.msra.mxu0 %v322_v6  ;;  %v147_v6 = vld [vmem:[#allocation2 + $0x1f0] sm:$0xff] }
  0x7a   :  { %662 = vmatprep.subr.mxu1 %v377_v7  ;;  %559 = vmatprep.subr.mxu0 %v320_v8  ;;  %v280_v7 = vld [vmem:[#allocation2 + $0x618] sm:$0xff]  ;;  %v99_v8 = vld [vmem:[#allocation2 + $0x70] sm:$0xff] }
  0x7b   :  { %663 = vmatpush1.msra.mxu1 %v376_v9  ;;  %560 = vmatpush1.msra.mxu0 %v319_v10  ;;  %v278_v9 = vld [vmem:[#allocation2 + $0x608] sm:$0xff]  ;;  %v144_v10 = vld [vmem:[#allocation2 + $0x1d8] sm:$0xff] }
  0x7c   :  { %551 = vmatmul.mubr.f32.gmra.mxu1 %v1631_v11  ;;  %561 = vmatprep.subr.mxu0 %v317_v12  ;;  %v277_v12 = vld [vmem:[#allocation2 + $0x600] sm:$0xff] }
  0x7d   :  { %664 = vmatprep.subr.mxu1 %v374_v13  ;;  %562 = vmatpush1.msra.mxu0 %v316_v14  ;;  %v96_v13 = vld [vmem:[#allocation2 + $0x58] sm:$0xff]  ;;  %v371_v14 = vld [vmem:[#allocation2 + $0x8f0] sm:$0xff] }
  0x7e   :  { %665 = vmatpush1.msra.mxu1 %v373_v15  ;;  %563 = vmatprep.subr.mxu0 %v314_v16  ;;  %v141_v15 = vld [vmem:[#allocation2 + $0x1c0] sm:$0xff]  ;;  %v370_v16 = vld [vmem:[#allocation2 + $0x8e8] sm:$0xff] }
  0x7f   :  { %698 = vmatprep.mubr.f32.mxu1 %v1555_v21  ;;  %564 = vmatpush1.msra.mxu0 %v313_v17  ;;  %v93_v17 = vld [vmem:[#allocation2 + $0x40] sm:$0xff] }
  0x80   :  { %1236 = vmatprep.subr.mxu1 %v180_v18  ;;  %565 = vmatprep.subr.mxu0 %v311_v19  ;;  %v368_v18 = vld [vmem:[#allocation2 + $0x8d8] sm:$0xff]  ;;  %v367_v19 = vld [vmem:[#allocation2 + $0x8d0] sm:$0xff] }
  0x81   :  { %1231 = vmatmul.mubr.msk.f32.vlgmr.msra.gmra.mxu1 %vm396_vm0, %v1637_v20  ;;  %566 = vmatpush1.msra.mxu0 %v310_v23  ;;  %v365_v23 = vld [vmem:[#allocation2 + $0x8c0] sm:$0xff] }
  0x82   :  { %1237 = vmatpush3.msra.mxu1 %v132_v22  ;;  %567 = vmatprep.subr.mxu0 %v308_v25  ;;  %v138_v22 = vld [vmem:[#allocation2 + $0x1a8] sm:$0xff] }
  0x83   :  { %1238 = vmatprep.subr.mxu1 %v177_v24  ;;  %568 = vmatpush1.msra.mxu0 %v307_v27  ;;  %v1657_v24 = vld [vmem:[%s1704_s0 + $0x68] sm:$0xff]  ;;  %v135_v27 = vld [vmem:[#allocation2 + $0x190] sm:$0xff] }
  0x84   :  { %1239 = vmatpush3.msra.mxu1 %v129_v26  ;;  %569 = vmatprep.subr.mxu0 %v305_v29  ;;  %v90_v25 = vld [vmem:[#allocation2 + $0x28] sm:$0xff]  ;;  %v364_v26 = vld [vmem:[#allocation2 + $0x8b8] sm:$0xff]  ;;  %v87_v29 = vld [vmem:[#allocation2 + $0x10] sm:$0xff] }
  0x85   :  { %1240 = vmatprep.subr.mxu1 %v174_v28  ;;  %570 = vmatpush1.msra.mxu0 %v304_v31  ;;  %v362_v28 = vld [vmem:[#allocation2 + $0x8a8] sm:$0xff]  ;;  %v276_v31 = vld [vmem:[#allocation2 + $0x5f8] sm:$0xff] }
  0x86   :  { %1241 = vmatpush3.msra.mxu1 %v126_v30  ;;  %571 = vmatprep.subr.mxu0 %v302_v33  ;;  %v361_v30 = vld [vmem:[#allocation2 + $0x8a0] sm:$0xff]  ;;  %v358_v33 = vld [vmem:[#allocation2 + $0x888] sm:$0xff] }
  0x87   :  { %1242 = vmatprep.subr.mxu1 %v171_v32  ;;  %572 = vmatpush1.msra.mxu0 %v301_v35  ;;  %v359_v32 = vld [vmem:[#allocation2 + $0x890] sm:$0xff]  ;;  %v356_v35 = vld [vmem:[#allocation2 + $0x878] sm:$0xff] }
  0x88   :  { %1243 = vmatpush3.msra.mxu1 %v123_v34  ;;  %573 = vmatprep.subr.mxu0 %v299_v37  ;;  %v273_v34 = vld [vmem:[#allocation2 + $0x5e0] sm:$0xff]  ;;  %v355_v37 = vld [vmem:[#allocation2 + $0x870] sm:$0xff] }
  0x89   :  { %1244 = vmatprep.subr.mxu1 %v168_v36  ;;  %574 = vmatpush1.msra.mxu0 %v298_v39  ;;  %v225_v36 = vld [vmem:[#allocation2 + $0x460] sm:$0xff] }
  0x8a   :  { %1245 = vmatpush3.msra.mxu1 %v120_v38  ;;  %575 = vmatprep.subr.mxu0 %v296_v41  ;;  %v270_v38 = vld [vmem:[#allocation2 + $0x5c8] sm:$0xff]  ;;  %v353_v39 = vld [vmem:[#allocation2 + $0x860] sm:$0xff]  ;;  %v352_v41 = vld [vmem:[#allocation2 + $0x858] sm:$0xff] }
  0x8b   :  { %1246 = vmatprep.subr.mxu1 %v165_v40  ;;  %576 = vmatpush1.msra.mxu0 %v295_v43  ;;  %v222_v40 = vld [vmem:[#allocation2 + $0x448] sm:$0xff]  ;;  %v219_v43 = vld [vmem:[#allocation2 + $0x430] sm:$0xff] }
  0x8c   :  { %1247 = vmatpush3.msra.mxu1 %v117_v42  ;;  %577 = vmatprep.subr.mxu0 %v293_v45  ;;  %v267_v42 = vld [vmem:[#allocation2 + $0x5b0] sm:$0xff] }
  0x8d   :  { %1248 = vmatprep.subr.mxu1 %v162_v44  ;;  %578 = vmatpush1.msra.mxu0 %v292_v47  ;;  %v349_v44 = vld [vmem:[#allocation2 + $0x840] sm:$0xff]  ;;  %v347_v45 = vld [vmem:[#allocation2 + $0x830] sm:$0xff]  ;;  %v346_v47 = vld [vmem:[#allocation2 + $0x828] sm:$0xff] }
  0x8e   :  { %1249 = vmatpush3.msra.mxu1 %v114_v46  ;;  %473 = vmatprep.mubr.f32.mxu0 %v1645_v49  ;;  %v216_v46 = vld [vmem:[#allocation2 + $0x418] sm:$0xff] }
  0x8f   :  { %1250 = vmatprep.subr.mxu1 %v159_v48  ;;  %579 = vmatprep.subr.mxu0 %v290_v50  ;;  %v261_v48 = vld [vmem:[#allocation2 + $0x580] sm:$0xff]  ;;  %v344_v50 = vld [vmem:[#allocation2 + $0x818] sm:$0xff] }
  0x90   :  { %1251 = vmatpush3.msra.mxu1 %v111_v51  ;;  %474 = vmatmul.mubr.f32.gmra.mxu0 %v1650_v52  ;;  %v213_v51 = vld [vmem:[#allocation2 + $0x400] sm:$0xff] }
  0x91   :  { %1252 = vmatprep.subr.mxu1 %v156_v53  ;;  %580 = vmatpush1.msra.mxu0 %v289_v54  ;;  %v343_v53 = vld [vmem:[#allocation2 + $0x810] sm:$0xff]  ;;  %v258_v54 = vld [vmem:[#allocation2 + $0x568] sm:$0xff] }
  0x92   :  { %1253 = vmatpush3.msra.mxu1 %v108_v55  ;;  %581 = vmatprep.subr.mxu0 %v287_v56  ;;  %v341_v55 = vld [vmem:[#allocation2 + $0x800] sm:$0xff]  ;;  %v210_v56 = vld [vmem:[#allocation2 + $0x3e8] sm:$0xff] }
  0x93   :  { %1254 = vmatprep.subr.mxu1 %v153_v57  ;;  %582 = vmatpush1.msra.mxu0 %v286_v58  ;;  %v340_v57 = vld [vmem:[#allocation2 + $0x7f8] sm:$0xff]  ;;  %v255_v58 = vld [vmem:[#allocation2 + $0x550] sm:$0xff] }
  0x94   :  { %1255 = vmatpush3.msra.mxu1 %v105_v59  ;;  %583 = vmatprep.subr.mxu0 %v284_v60  ;;  %v338_v59 = vld [vmem:[#allocation2 + $0x7e8] sm:$0xff]  ;;  %v207_v60 = vld [vmem:[#allocation2 + $0x3d0] sm:$0xff] }
  0x95   :  { %1256 = vmatprep.subr.mxu1 %v150_v61  ;;  %584 = vmatpush1.msra.mxu0 %v283_v62  ;;  %v337_v61 = vld [vmem:[#allocation2 + $0x7e0] sm:$0xff]  ;;  %v252_v62 = vld [vmem:[#allocation2 + $0x538] sm:$0xff] }
  0x96   :  { %1257 = vmatpush3.msra.mxu1 %v102_v0  ;;  %585 = vmatprep.subr.mxu0 %v281_v4  ;;  %v335_v0 = vld [vmem:[#allocation2 + $0x7d0] sm:$0xff]  ;;  %v204_v4 = vld [vmem:[#allocation2 + $0x3b8] sm:$0xff] }
  0x97   :  { %1258 = vmatprep.subr.mxu1 %v147_v6  ;;  %586 = vmatpush1.msra.mxu0 %v280_v7  ;;  %v334_v6 = vld [vmem:[#allocation2 + $0x7c8] sm:$0xff]  ;;  %v249_v7 = vld [vmem:[#allocation2 + $0x520] sm:$0xff] }
  0x98   :  { %1259 = vmatpush3.msra.mxu1 %v99_v8  ;;  %587 = vmatprep.subr.mxu0 %v278_v9  ;;  %v332_v8 = vld [vmem:[#allocation2 + $0x7b8] sm:$0xff]  ;;  %v201_v9 = vld [vmem:[#allocation2 + $0x3a0] sm:$0xff] }
  0x99   :  { %1260 = vmatprep.subr.mxu1 %v144_v10  ;;  %588 = vmatpush1.msra.mxu0 %v277_v12  ;;  %v331_v10 = vld [vmem:[#allocation2 + $0x7b0] sm:$0xff]  ;;  %v246_v12 = vld [vmem:[#allocation2 + $0x508] sm:$0xff] }
  0x9a   :  { %1261 = vmatpush3.msra.mxu1 %v96_v13  ;;  %589 = vmatprep.subr.mxu0 %v371_v14  ;;  %v329_v13 = vld [vmem:[#allocation2 + $0x7a0] sm:$0xff]  ;;  %v198_v14 = vld [vmem:[#allocation2 + $0x388] sm:$0xff] }
  0x9b   :  { %1262 = vmatprep.subr.mxu1 %v141_v15  ;;  %590 = vmatpush2.msra.mxu0 %v370_v16  ;;  %v328_v15 = vld [vmem:[#allocation2 + $0x798] sm:$0xff]  ;;  %v243_v16 = vld [vmem:[#allocation2 + $0x4f0] sm:$0xff] }
  0x9c   :  { %1263 = vmatpush3.msra.mxu1 %v93_v17  ;;  %591 = vmatprep.subr.mxu0 %v368_v18  ;;  %v326_v17 = vld [vmem:[#allocation2 + $0x788] sm:$0xff]  ;;  %v195_v18 = vld [vmem:[#allocation2 + $0x370] sm:$0xff] }
  0x9d   :  { %704 = vmatprep.mubr.f32.mxu1 %v1555_v21  ;;  %592 = vmatpush2.msra.mxu0 %v367_v19  ;;  %v228_v21 = vld [vmem:[#allocation2 + $0x478] sm:$0xff]  ;;  %v325_v19 = vld [vmem:[#allocation2 + $0x780] sm:$0xff] }
  0x9e   :  { %1264 = vmatprep.subr.mxu1 %v138_v22  ;;  %593 = vmatprep.subr.mxu0 %v365_v23  ;;  %v76_v22 = vld [vmem:[%s1704_s0 + $0x28] sm:$0xff]  ;;  %v240_v23 = vld [vmem:[#allocation2 + $0x4d8] sm:$0xff] }
  0x9f   :  { %1232 = vmatmul.mubr.msk.f32.gmra.mxu1 %vm396_vm0, %v1657_v24  ;;  %594 = vmatpush2.msra.mxu0 %v364_v26  ;;  %v192_v26 = vld [vmem:[#allocation2 + $0x358] sm:$0xff] }
  0xa0   :  { %1265 = vmatpush3.msra.mxu1 %v90_v25  ;;  %595 = vmatprep.subr.mxu0 %v362_v28  ;;  %v1670_v25 = vld [vmem:[%s1704_s0 + $0x20] sm:$0xff] }
  0xa1   :  { %1266 = vmatprep.subr.mxu1 %v135_v27  ;;  %596 = vmatpush2.msra.mxu0 %v361_v30  ;;  %v372_v27 = vld [vmem:[#allocation2 + $0x8f8] sm:$0xff]  ;;  %v237_v28 = vld [vmem:[#allocation2 + $0x4c0] sm:$0xff] }
  0xa2   :  { %1267 = vmatpush3.msra.mxu1 %v87_v29  ;;  %775 = vmatprep.mubr.f32.mxu1 %v1601_v63  ;;  %v350_v63 = vld [vmem:[#allocation2 + $0x848] sm:$0xff]  ;;  %v324_v29 = vld [vmem:[#allocation2 + $0x778] sm:$0xff]  ;;  %v189_v30 = vld [vmem:[#allocation2 + $0x340] sm:$0xff] }
  0xa3   :  { %1274 = vmatprep.subr.mxu1 %v276_v31  ;;  %597 = vmatprep.subr.mxu0 %v359_v32  ;;  %v369_v31 = vld [vmem:[#allocation2 + $0x8e0] sm:$0xff] }
  0xa4   :  { %776 = vmatmul.mubr.f32.vlgmr.msra.gmra.mxu1 %v1611_v2  ;;  %598 = vmatpush2.msra.mxu0 %v358_v33  ;;  %v264_v2 = vld [vmem:[#allocation2 + $0x598] sm:$0xff]  ;;  %v1676_v32 = vld [vmem:[%s1704_s0 + $0x60] sm:$0xff] }
  0xa5   :  { %1275 = vmatpush3.msra.mxu1 %v228_v21  ;;  %599 = vmatprep.subr.mxu0 %v356_v35  ;;  %v234_v21 = vld [vmem:[#allocation2 + $0x4a8] sm:$0xff]  ;;  %v321_v33 = vld [vmem:[#allocation2 + $0x760] sm:$0xff] }
  0xa6   :  { %1276 = vmatprep.subr.mxu1 %v273_v34  ;;  %600 = vmatpush2.msra.mxu0 %v355_v37  ;;  %v1682_v34 = vld [vmem:[%s1704_s0 + $0x58] sm:$0xff]  ;;  %v186_v35 = vld [vmem:[#allocation2 + $0x328] sm:$0xff]  ;;  %v231_v37 = vld [vmem:[#allocation2 + $0x490] sm:$0xff] }
  0xa7   :  { %1277 = vmatpush3.msra.mxu1 %v225_v36  ;;  %601 = vmatprep.subr.mxu0 %v353_v39  ;;  %v366_v36 = vld [vmem:[#allocation2 + $0x8c8] sm:$0xff]  ;;  %v363_v39 = vld [vmem:[#allocation2 + $0x8b0] sm:$0xff] }
  0xa8   :  { %1278 = vmatprep.subr.mxu1 %v270_v38  ;;  %602 = vmatpush2.msra.mxu0 %v352_v41  ;;  %v318_v38 = vld [vmem:[#allocation2 + $0x748] sm:$0xff]  ;;  %v360_v41 = vld [vmem:[#allocation2 + $0x898] sm:$0xff] }
  0xa9   :  { %1279 = vmatpush3.msra.mxu1 %v222_v40  ;;  %603 = vmatprep.subr.mxu0 %v350_v63  ;;  %v315_v40 = vld [vmem:[#allocation2 + $0x730] sm:$0xff]  ;;  %v357_v63 = vld [vmem:[#allocation2 + $0x880] sm:$0xff] }
  0xaa   :  { %1280 = vmatprep.subr.mxu1 %v267_v42  ;;  %604 = vmatpush2.msra.mxu0 %v349_v44  ;;  %v378_v42 = vld [vmem:[#allocation2 + $0x928] sm:$0xff] }
  0xab   :  { %1281 = vmatpush3.msra.mxu1 %v219_v43  ;;  %605 = vmatprep.subr.mxu0 %v347_v45  ;;  %v309_v43 = vld [vmem:[#allocation2 + $0x700] sm:$0xff]  ;;  %v354_v44 = vld [vmem:[#allocation2 + $0x868] sm:$0xff]  ;;  %v375_v45 = vld [vmem:[#allocation2 + $0x910] sm:$0xff] }
  0xac   :  { %1282 = vmatprep.subr.mxu1 %v264_v2  ;;  %606 = vmatpush2.msra.mxu0 %v346_v47  ;;  %v306_v2 = vld [vmem:[#allocation2 + $0x6e8] sm:$0xff]  ;;  %v300_v47 = vld [vmem:[#allocation2 + $0x6b8] sm:$0xff] }
  0xad   :  { %1283 = vmatpush3.msra.mxu1 %v216_v46  ;;  %607 = vmatprep.subr.mxu0 %v344_v50  ;;  %v303_v46 = vld [vmem:[#allocation2 + $0x6d0] sm:$0xff]  ;;  %v294_v50 = vld [vmem:[#allocation2 + $0x688] sm:$0xff] }
  0xae   :  { %1284 = vmatprep.subr.mxu1 %v261_v48  ;;  %608 = vmatpush2.msra.mxu0 %v343_v53  ;;  %v297_v48 = vld [vmem:[#allocation2 + $0x6a0] sm:$0xff]  ;;  %v291_v53 = vld [vmem:[#allocation2 + $0x670] sm:$0xff] }
  0xaf   :  { %1285 = vmatpush3.msra.mxu1 %v213_v51  ;;  %609 = vmatprep.subr.mxu0 %v341_v55  ;;  %v339_v51 = vld [vmem:[#allocation2 + $0x7f0] sm:$0xff]  ;;  %v288_v55 = vld [vmem:[#allocation2 + $0x658] sm:$0xff] }
  0xb0   :  { %1286 = vmatprep.subr.mxu1 %v258_v54  ;;  %610 = vmatpush2.msra.mxu0 %v340_v57  ;;  %v336_v54 = vld [vmem:[#allocation2 + $0x7d8] sm:$0xff]  ;;  %v1032_v57 = vld [vmem:[#allocation6 + $0x78] sm:$0xff] }
  0xb1   :  { %1287 = vmatpush3.msra.mxu1 %v210_v56  ;;  %611 = vmatprep.subr.mxu0 %v338_v59  ;;  %v1048_v56 = vld [vmem:[#allocation6 + $0xf8] sm:$0xff]  ;;  %v1031_v59 = vld [vmem:[#allocation6 + $0x70] sm:$0xff] }
  0xb2   :  { %1288 = vmatprep.subr.mxu1 %v255_v58  ;;  %612 = vmatpush2.msra.mxu0 %v337_v61  ;;  %v333_v58 = vld [vmem:[#allocation2 + $0x7c0] sm:$0xff]  ;;  %v330_v61 = vld [vmem:[#allocation2 + $0x7a8] sm:$0xff] }
  0xb3   :  { %1289 = vmatpush3.msra.mxu1 %v207_v60  ;;  %613 = vmatprep.subr.mxu0 %v335_v0  ;;  %v1046_v60 = vld [vmem:[#allocation6 + $0xe8] sm:$0xff]  ;;  %v282_v0 = vld [vmem:[#allocation2 + $0x628] sm:$0xff] }
  0xb4   :  { %1290 = vmatprep.subr.mxu1 %v252_v62  ;;  %614 = vmatpush2.msra.mxu0 %v334_v6  ;;  %v1030_v62 = vld [vmem:[#allocation6 + $0x68] sm:$0xff]  ;;  %v327_v6 = vld [vmem:[#allocation2 + $0x790] sm:$0xff] }
  0xb5   :  { %1291 = vmatpush3.msra.mxu1 %v204_v4  ;;  %615 = vmatprep.subr.mxu0 %v332_v8  ;;  %v1045_v4 = vld [vmem:[#allocation6 + $0xe0] sm:$0xff] }
  0xb6   :  { %1292 = vmatprep.subr.mxu1 %v249_v7  ;;  %616 = vmatpush2.msra.mxu0 %v331_v10  ;;  %v1029_v7 = vld [vmem:[#allocation6 + $0x60] sm:$0xff]  ;;  %v1028_v10 = vld [vmem:[#allocation6 + $0x58] sm:$0xff] }
  0xb7   :  { %1293 = vmatpush3.msra.mxu1 %v201_v9  ;;  %617 = vmatprep.subr.mxu0 %v329_v13  ;;  %v279_v8 = vld [vmem:[#allocation2 + $0x610] sm:$0xff]  ;;  %v1027_v13 = vld [vmem:[#allocation6 + $0x50] sm:$0xff] }
  0xb8   :  { %1294 = vmatprep.subr.mxu1 %v246_v12  ;;  %618 = vmatpush2.msra.mxu0 %v328_v15  ;;  %v1044_v9 = vld [vmem:[#allocation6 + $0xd8] sm:$0xff]  ;;  %v1043_v12 = vld [vmem:[#allocation6 + $0xd0] sm:$0xff]  ;;  %v1026_v15 = vld [vmem:[#allocation6 + $0x48] sm:$0xff] }
  0xb9   :  { %1295 = vmatpush3.msra.mxu1 %v198_v14  ;;  %619 = vmatprep.subr.mxu0 %v326_v17  ;;  %v1042_v14 = vld [vmem:[#allocation6 + $0xc8] sm:$0xff]  ;;  %v1025_v17 = vld [vmem:[#allocation6 + $0x40] sm:$0xff] }
  0xba   :  { %1296 = vmatprep.subr.mxu1 %v243_v16  ;;  %620 = vmatpush2.msra.mxu0 %v325_v19  ;;  %v1041_v16 = vld [vmem:[#allocation6 + $0xc0] sm:$0xff]  ;;  %v1024_v19 = vld [vmem:[#allocation6 + $0x38] sm:$0xff] }
  0xbb   :  { %1297 = vmatpush3.msra.mxu1 %v195_v18  ;;  %621 = vmatprep.mubr.f32.mxu0 %v76_v22  ;;  %v1040_v18 = vld [vmem:[#allocation6 + $0xb8] sm:$0xff] }
  0xbc   :  { %1298 = vmatprep.subr.mxu1 %v240_v23  ;;  %622 = vmatmul.mubr.f32.vlgmr.msra.gmra.mxu0 %v1670_v25  ;;  %v1023_v23 = vld [vmem:[#allocation6 + $0x30] sm:$0xff] }
  0xbd   :  { %1299 = vmatpush3.msra.mxu1 %v192_v26  ;;  %1312 = vmatprep.subr.mxu0 %v372_v27  ;;  %v1022_v26 = vld [vmem:[#allocation6 + $0x28] sm:$0xff]  ;;  %v1037_v27 = vld [vmem:[#allocation6 + $0xa0] sm:$0xff] }
  0xbe   :  { %1300 = vmatprep.subr.mxu1 %v237_v28  ;;  %1313 = vmatpush3.msra.mxu0 %v324_v29  ;;  %v1021_v28 = vld [vmem:[#allocation6 + $0x20] sm:$0xff]  ;;  %v1036_v29 = vld [vmem:[#allocation6 + $0x98] sm:$0xff] }
  0xbf   :  { %780 = vmatprep.mubr.f32.mxu1 %v1645_v49  ;;  %1301 = vmatpush3.msra.mxu1 %v189_v30  ;;  %v183_v49 = vld [vmem:[#allocation2 + $0x310] sm:$0xff] }
  0xc0   :  { %1314 = vmatprep.subr.mxu0 %v369_v31  ;;  %627 = vmatprep.mubr.f32.mxu0 %v1676_v32  ;;  %v1020_v30 = vld [vmem:[#allocation6 + $0x18] sm:$0xff]  ;;  %v1035_v31 = vld [vmem:[#allocation6 + $0x90] sm:$0xff] }
  0xc1   :  { %781 = vmatmul.mubr.f32.gmra.mxu1 %v1650_v52  ;;  %1302 = vmatprep.subr.mxu1 %v234_v21  ;;  %v312_v52 = vld [vmem:[#allocation2 + $0x718] sm:$0xff] }
  0xc2   :  { %1315 = vmatpush3.msra.mxu0 %v321_v33  ;;  %1303 = vmatpush3.msra.mxu1 %v186_v35  ;;  %v1034_v21 = vld [vmem:[#allocation6 + $0x88] sm:$0xff]  ;;  %v1017_v35 = vld [vmem:[#allocation6] sm:$0xff] }
  0xc3   :  { %628 = vmatmul.mubr.f32.gmra.mxu0 %v1682_v34  ;;  %1316 = vmatprep.subr.mxu0 %v366_v36  ;;  %v1018_v33 = vld [vmem:[#allocation6 + $0x8] sm:$0xff]  ;;  %v1064_v36 = vld [vmem:[#allocation6 + $0x178] sm:$0xff] }
  0xc4   :  { %1304 = vmatprep.subr.mxu1 %v231_v37  ;;  %1317 = vmatpush3.msra.mxu0 %v318_v38  ;;  %v1063_v37 = vld [vmem:[#allocation6 + $0x170] sm:$0xff]  ;;  %v1062_v38 = vld [vmem:[#allocation6 + $0x168] sm:$0xff] }
  0xc5   :  { %1305 = vmatpush3.msra.mxu1 %v183_v49  ;;  %850 = vmatprep.mubr.f32.mxu1 %v1606_v1  ;;  %v351_v1 = vld [vmem:[#allocation2 + $0x850] sm:$0xff] }
  0xc6   :  { %1318 = vmatprep.subr.mxu0 %v363_v39  ;;  %851 = vmatmul.mubr.f32.vlgmr.msra.gmra.mxu1 %v1616_v3  ;;  %v348_v3 = vld [vmem:[#allocation2 + $0x838] sm:$0xff]  ;;  %v1060_v39 = vld [vmem:[#allocation6 + $0x158] sm:$0xff] }
  0xc7   :  { %1319 = vmatpush3.msra.mxu0 %v315_v40  ;;  %855 = vmatprep.mubr.f32.mxu1 %v1622_v5  ;;  %v345_v5 = vld [vmem:[#allocation2 + $0x820] sm:$0xff]  ;;  %v1061_v49 = vld [vmem:[#allocation6 + $0x160] sm:$0xff] }
  0xc8   :  { %1320 = vmatprep.subr.mxu0 %v360_v41  ;;  %1410 = vmatprep.subr.mxu1 %v378_v42  ;;  %v1059_v40 = vld [vmem:[#allocation6 + $0x150] sm:$0xff]  ;;  %v1058_v41 = vld [vmem:[#allocation6 + $0x148] sm:$0xff] }
  0xc9   :  { %1321 = vmatpush3.msra.mxu0 %v312_v52  ;;  %925 = vmatprep.mubr.f32.mxu0 %v76_v22  ;;  %v1039_v22 = vld [vmem:[#allocation6 + $0xb0] sm:$0xff]  ;;  %v1057_v52 = vld [vmem:[#allocation6 + $0x140] sm:$0xff] }
  0xca   :  { %1322 = vmatprep.subr.mxu0 %v357_v63  ;;  %856 = vmatmul.mubr.f32.gmra.mxu1 %v1631_v11  ;;  %v342_v11 = vld [vmem:[#allocation2 + $0x808] sm:$0xff] }
  0xcb   :  { %1323 = vmatpush3.msra.mxu0 %v309_v43  ;;  %1411 = vmatpush3.msra.mxu1 %v378_v42  ;;  %v1056_v42 = vld [vmem:[#allocation6 + $0x138] sm:$0xff]  ;;  %v1055_v63 = vld [vmem:[#allocation6 + $0x130] sm:$0xff]  ;;  %v1054_v43 = vld [vmem:[#allocation6 + $0x128] sm:$0xff] }
  0xcc   :  { %1324 = vmatprep.subr.mxu0 %v354_v44  ;;  %1412 = vmatprep.subr.mxu1 %v375_v45  ;;  %v1053_v44 = vld [vmem:[#allocation6 + $0x120] sm:$0xff] }
  0xcd   :  { %1325 = vmatpush3.msra.mxu0 %v306_v2  ;;  %1413 = vmatpush3.msra.mxu1 %v375_v45  ;;  %v1052_v2 = vld [vmem:[#allocation6 + $0x118] sm:$0xff]  ;;  %v1051_v45 = vld [vmem:[#allocation6 + $0x110] sm:$0xff] }
  0xce   :  { %1326 = vmatprep.subr.mxu0 %v351_v1  ;;  %1414 = vmatprep.mubr.msk.f32.mxu1 %vm396_vm0, %v1637_v20  ;;  %v1047_v20 = vld [vmem:[#allocation6 + $0xf0] sm:$0xff]  ;;  %v1050_v1 = vld [vmem:[#allocation6 + $0x108] sm:$0xff] }
  0xcf   :  { %1327 = vmatpush3.msra.mxu0 %v303_v46  ;;  %1415 = vmatmul.mubr.msk.f32.vlgmr.msra.gmra.mxu1 %vm396_vm0, %v1657_v24  ;;  %v285_v24 = vld [vmem:[#allocation2 + $0x640] sm:$0xff]  ;;  %v1049_v46 = vld [vmem:[#allocation6 + $0x100] sm:$0xff] }
  0xd0   :  { %1328 = vmatprep.subr.mxu0 %v348_v3  ;;  %1354 = vmatprep.subr.mxu1 %v1048_v56  ;;  %v381_v3 = vlaneseq }
  0xd1   :  { %1329 = vmatpush3.msra.mxu0 %v300_v47  ;;  %1355 = vmatpush3.msra.mxu1 %v1032_v57 }
  0xd2   :  { %1330 = vmatprep.subr.mxu0 %v345_v5  ;;  %1356 = vmatprep.subr.mxu1 %v1047_v20  ;;  %v382_v5 = vshrl.u32 %v381_v3, 7 }
  0xd3   :  { %1331 = vmatpush3.msra.mxu0 %v297_v48  ;;  %1357 = vmatpush3.msra.mxu1 %v1031_v59 }
  0xd4   :  { %1332 = vmatprep.subr.mxu0 %v342_v11  ;;  %1358 = vmatprep.subr.mxu1 %v1046_v60  ;;  %v383_v11 = vsub.s32 0, %v382_v5 }
  0xd5   :  { %1333 = vmatpush3.msra.mxu0 %v294_v50  ;;  %1359 = vmatpush3.msra.mxu1 %v1030_v62 }
  0xd6   :  { %1334 = vmatprep.subr.mxu0 %v339_v51  ;;  %1360 = vmatprep.subr.mxu1 %v1045_v4  ;;  %v379_v51 = vld [vmem:[#allocation4] sm:$0x7] }
  0xd7   :  { %1335 = vmatpush3.msra.mxu0 %v291_v53  ;;  %1361 = vmatpush3.msra.mxu1 %v1029_v7 }
  0xd8   :  { %1336 = vmatprep.subr.mxu0 %v336_v54  ;;  %1362 = vmatprep.subr.mxu1 %v1044_v9  ;;  %v387_v54 = vsub.s32 1, %v382_v5 }
  0xd9   :  { %1337 = vmatpush3.msra.mxu0 %v288_v55  ;;  %1363 = vmatpush3.msra.mxu1 %v1028_v10  ;;  %v384_v55 = vrot.slane %v379_v51, %v383_v11 }
  0xda   :  { %1338 = vmatprep.subr.mxu0 %v333_v58  ;;  %1364 = vmatprep.subr.mxu1 %v1043_v12  ;;  %v388_v20 = vrot.slane %v379_v51, %v387_v54 }
  0xdb   :  { %1339 = vmatpush3.msra.mxu0 %v285_v24  ;;  %1365 = vmatpush3.msra.mxu1 %v1027_v13 }
  0xdc   :  { %1340 = vmatprep.subr.mxu0 %v330_v61  ;;  %1366 = vmatprep.subr.mxu1 %v1042_v14 }
  0xdd   :  { %1341 = vmatpush3.msra.mxu0 %v282_v0  ;;  %1367 = vmatpush3.msra.mxu1 %v1026_v15 }
  0xde   :  { %1342 = vmatprep.subr.mxu0 %v327_v6  ;;  %1368 = vmatprep.subr.mxu1 %v1041_v16 }
  0xdf   :  { %1343 = vmatpush3.msra.mxu0 %v279_v8  ;;  %1369 = vmatpush3.msra.mxu1 %v1025_v17 }
  0xe0   :  { %926 = vmatmul.mubr.f32.vlgmr.msra.gmra.mxu0 %v1670_v25  ;;  %1370 = vmatprep.subr.mxu1 %v1040_v18  ;;  %v1038_v25 = vld [vmem:[#allocation6 + $0xa8] sm:$0xff] }
  0xe1   :  { %930 = vmatprep.mubr.f32.mxu0 %v1676_v32  ;;  %1371 = vmatpush3.msra.mxu1 %v1024_v19  ;;  %v1019_v32 = vld [vmem:[#allocation6 + $0x10] sm:$0xff] }
  0xe2   :  { %1372 = vmatprep.subr.mxu1 %v1039_v22  ;;  %1417 = vmatprep.subr.mxu0 %v1064_v36 }
  0xe3   :  { %1373 = vmatpush3.msra.mxu1 %v1023_v23  ;;  %1418 = vmatpush3.msra.mxu0 %v1064_v36 }
  0xe4   :  { %931 = vmatmul.mubr.f32.gmra.mxu0 %v1682_v34  ;;  %1374 = vmatprep.subr.mxu1 %v1038_v25  ;;  %v1033_v34 = vld [vmem:[#allocation6 + $0x80] sm:$0xff] }
  0xe5   :  { %1375 = vmatpush3.msra.mxu1 %v1022_v26  ;;  %1419 = vmatprep.subr.mxu0 %v1063_v37 }
  0xe6   :  { %1376 = vmatprep.subr.mxu1 %v1037_v27  ;;  %1420 = vmatpush3.msra.mxu0 %v1063_v37  ;;  %v391_v37 = vsub.s32 2, %v382_v5 }
  0xe7   :  { %1377 = vmatpush3.msra.mxu1 %v1021_v28  ;;  %1421 = vmatprep.subr.mxu0 %v1062_v38 }
  0xe8   :  { %1378 = vmatprep.subr.mxu1 %v1036_v29  ;;  %1422 = vmatpush3.msra.mxu0 %v1062_v38 }
  0xe9   :  { %1379 = vmatpush3.msra.mxu1 %v1020_v30  ;;  %1423 = vmatprep.subr.mxu0 %v1061_v49 }
  0xea   :  { %1380 = vmatprep.subr.mxu1 %v1035_v31  ;;  %1424 = vmatpush3.msra.mxu0 %v1061_v49  ;;  %v392_v49 = vrot.slane %v379_v51, %v391_v37 }
  0xeb   :  { %1381 = vmatpush3.msra.mxu1 %v1019_v32  ;;  %1425 = vmatprep.subr.mxu0 %v1060_v39 }
  0xec   :  { %1382 = vmatprep.subr.mxu1 %v1034_v21  ;;  %1426 = vmatpush3.msra.mxu0 %v1060_v39 }
  0xed   :  { %1383 = vmatpush3.msra.mxu1 %v1018_v33  ;;  %1427 = vmatprep.subr.mxu0 %v1059_v40 }
  0xee   :  { %1384 = vmatprep.subr.mxu1 %v1033_v34  ;;  %1428 = vmatpush3.msra.mxu0 %v1059_v40 }
  0xef   :  { %1385 = vmatpush3.msra.mxu1 %v1017_v35  ;;  %1429 = vmatprep.subr.mxu0 %v1058_v41 }
  0xf0   :  { %1430 = vmatpush3.msra.mxu0 %v1058_v41 }
  0xf1   :  { %1431 = vmatprep.subr.mxu0 %v1057_v52 }
  0xf2   :  { %1432 = vmatpush3.msra.mxu0 %v1057_v52 }
  0xf3   :  { %1433 = vmatprep.subr.mxu0 %v1056_v42 }
  0xf4   :  { %1434 = vmatpush3.msra.mxu0 %v1056_v42 }
  0xf5   :  { %1435 = vmatprep.subr.mxu0 %v1055_v63 }
  0xf6   :  { %1436 = vmatpush3.msra.mxu0 %v1055_v63 }
  0xf7   :  { %1437 = vmatprep.subr.mxu0 %v1054_v43 }
  0xf8   :  { %1438 = vmatpush3.msra.mxu0 %v1054_v43 }
  0xf9   :  { %1439 = vmatprep.subr.mxu0 %v1053_v44 }
  0xfa   :  { %1440 = vmatpush3.msra.mxu0 %v1053_v44 }
  0xfb   :  { %1441 = vmatprep.subr.mxu0 %v1052_v2 }
  0xfc   :  { %1442 = vmatpush3.msra.mxu0 %v1052_v2 }
  0xfd   :  { %1443 = vmatprep.subr.mxu0 %v1051_v45 }
  0xfe   :  { %1444 = vmatpush3.msra.mxu0 %v1051_v45 }
  0xff   :  { %1445 = vmatprep.subr.mxu0 %v1050_v1 }
 0x100   :  { %1446 = vmatpush3.msra.mxu0 %v1050_v1 }
 0x101   :  { %1447 = vmatprep.subr.mxu0 %v1049_v46 }
 0x102   :  { %1448 = vmatpush3.msra.mxu0 %v1049_v46 }
 0x137   :  { %v469_v53 = vpop.f32.mrf.mxu0 }
 0x138   :  { %v546_v47 = vpop.f32.mrf.mxu1  ;;  %v470_v59 = vadd.f32 %v469_v53, %v384_v55 }
 0x139   :  { %v471_v57 = vpop.f32.mrf.mxu0 }
 0x13a   :  { %v548_v48 = vpop.f32.mrf.mxu1  ;;  %v472_v60 = vadd.f32 %v471_v57, %v388_v20  ;;  %v547_v62 = vadd.f32 %v546_v47, %v470_v59 }
 0x13c   :  { %v552_v50 = vpop.f32.mrf.mxu1  ;;  %v549_v6 = vadd.f32 %v548_v48, %v472_v60 }
 0x13e   :  { %v554_v56 = vpop.f32.mrf.mxu1 }
 0x141   :  { %v700_v24 = vpop.f32.mrf.mxu1 }
 0x143   :  { %v702_v0 = vpop.f32.mrf.mxu1 }
 0x150   :  { %v475_v58 = vpop.f32.mrf.mxu0 }
 0x151   :  { %v476_v7 = vadd.f32 %v475_v58, %v384_v55 }
 0x152   :  { %v477_v61 = vpop.f32.mrf.mxu0 }
 0x153   :  { %v478_v12 = vadd.f32 %v477_v61, %v388_v20  ;;  %v553_v15 = vadd.f32 %v552_v50, %v476_v7  ;;  %v1235_v61 = vld [vmem:[#allocation7] ss:$0 sm:$0xff] }
 0x155   :  { %v555_v19 = vadd.f32 %v554_v56, %v478_v12 }
 0x15f   :  { %v706_v8 = vpop.f32.mrf.mxu1 }
 0x161   :  { %v708_v16 = vpop.f32.mrf.mxu1 }
 0x164   :  { %v1268_v27 = vpop.f32.mrf.mxu1 }
 0x166   :  { %v1269_v31 = vpop.f32.mrf.mxu1 }
 0x167   :  { %v1270_v39 = vadd.f32 %v1269_v31, %v1268_v27 }
 0x169   :  { %v778_v43 = vadd.f32 %v1270_v39, %v392_v49 }
 0x17c   :  { %v623_v4 = vpop.f32.mrf.mxu0 }
 0x17d   :  { %v624_v9 = vadd.f32 %v623_v4, %v547_v62 }
 0x17e   :  { %v625_v10 = vpop.f32.mrf.mxu0 }
 0x17f   :  { %v626_v13 = vadd.f32 %v625_v10, %v549_v6  ;;  %v701_v14 = vadd.f32 %v700_v24, %v624_v9 }
 0x181   :  { %v703_v17 = vadd.f32 %v702_v0, %v626_v13  ;;  %v1011_v25 = vmax.f32 %v701_v14, 0.0  ;;  %v1271_v33 = vpop.f32.mrf.mxu1 }
 0x183   :  { %v629_v18 = vpop.f32.mrf.mxu0  ;;  %v1012_v22 = vmax.f32 %v703_v17, 0.0  ;;  %v1272_v34 = vpop.f32.mrf.mxu1 }
 0x184   :  { %v630_v23 = vadd.f32 %v629_v18, %v553_v15  ;;  %v1273_v41 = vadd.f32 %v1272_v34, %v1271_v33 }
 0x185   :  { %v631_v26 = vpop.f32.mrf.mxu0  ;;  %1136 = vmatprep.mubr.f32.mxu1 %v1012_v22 }
 0x186   :  { %v632_v28 = vadd.f32 %v631_v26, %v555_v19  ;;  %v707_v29 = vadd.f32 %v706_v8, %v630_v23  ;;  %1137 = vmatmul.mubr.f32.vlgmr.msra.gmra.mxu1 %v1011_v25  ;;  %v1306_v35 = vpop.f32.mrf.mxu1  ;;  %v783_v2 = vadd.f32 %v1273_v41, %v392_v49 }
 0x188   :  { %v709_v30 = vadd.f32 %v708_v16, %v632_v28  ;;  %v1014_v21 = vmax.f32 %v707_v29, 0.0  ;;  %v1307_v36 = vpop.f32.mrf.mxu1 }
 0x189   :  { %v1308_v52 = vadd.f32 %v1307_v36, %v1306_v35 }
 0x18a   :  { %v1015_v32 = vmax.f32 %v709_v30, 0.0  ;;  %v1309_v38 = vpop.f32.mrf.mxu1 }
 0x18b   :  { %v853_v45 = vadd.f32 %v1308_v52, %v778_v43 }
 0x18c   :  { %1141 = vmatprep.mubr.f32.mxu1 %v1015_v32  ;;  %v1310_v40 = vpop.f32.mrf.mxu1 }
 0x18d   :  { %1142 = vmatmul.mubr.f32.gmra.mxu1 %v1014_v21  ;;  %v1311_v1 = vadd.f32 %v1310_v40, %v1309_v38 }
 0x18f   :  { %v1416_v63 = vpop.f32.mrf.mxu1  ;;  %v858_v50 = vadd.f32 %v1311_v1, %v783_v2 }
 0x191   :  { %v1002_v47 = vpop.f32.mrf.mxu1 }
 0x1a0   :  { %v1344_v42 = vpop.f32.mrf.mxu0 }
 0x1a2   :  { %v1345_v44 = vpop.f32.mrf.mxu0 }
 0x1a3   :  { %v1346_v46 = vadd.f32 %v1345_v44, %v1344_v42 }
 0x1a4   :  { %v1347_v3 = vpop.f32.mrf.mxu0 }
 0x1a5   :  { %v928_v48 = vadd.f32 %v1346_v46, %v853_v45 }
 0x1a6   :  { %v1348_v11 = vpop.f32.mrf.mxu0 }
 0x1a7   :  { %v1349_v5 = vadd.f32 %v1348_v11, %v1347_v3  ;;  %v1003_v53 = vadd.f32 %v1002_v47, %v928_v48 }
 0x1a9   :  { %v933_v51 = vadd.f32 %v1349_v5, %v858_v50  ;;  %v1013_v54 = vmax.f32 %v1003_v53, 0.0 }
 0x1ab   :  { %v1008_v55 = vadd.f32 %v1416_v63, %v933_v51  ;;  %1449 = vmatprep.mubr.f32.mxu0 %v1013_v54 }
 0x1ad   :  { %v1016_v56 = vmax.f32 %v1008_v55, 0.0 }
 0x1af   :  { %1450 = vmatmul.mubr.f32.vlgmr.msra.gmra.mxu0 %v1016_v56 }
 0x246   :  { %v1386_v57 = vpop.f32.mrf.mxu1 }
 0x248   :  { %v1387_v20 = vpop.f32.mrf.mxu1 }
 0x249   :  { %v1388_v60 = vadd.f32 %v1387_v20, %v1386_v57 }
 0x24b   :  { %v1139_v6 = vadd.f32 %v1388_v60, %v1235_v61 }
 0x24d   :  { %v1389_v58 = vpop.f32.mrf.mxu1 }
 0x24f   :  { %v1390_v59 = vpop.f32.mrf.mxu1 }
 0x250   :  { %v1391_v24 = vadd.f32 %v1390_v59, %v1389_v58 }
 0x252   :  { %v1144_v62 = vadd.f32 %v1391_v24, %v1235_v61 }
 0x26f   :  { %v1451_v0 = vpop.f32.mrf.mxu0 }
 0x270   :  { %v1219_v4 = vadd.f32 %v1451_v0, %v1144_v62 }
 0x271   :  { %v1213_v7 = vpop.f32.mrf.mxu0 }
 0x272   :  { %1223 = vst [vmem:[%s1709_s5 + $0x8] sm:$0xff] %v1219_v4  ;;  %v1214_v8 = vadd.f32 %v1213_v7, %v1139_v6 }
 0x274   :  { %1222 = vst [vmem:[%s1709_s5] sm:$0xff] %v1214_v8 }
 0x275   :  { %1228 = vsyncpa [#allocation3], 1 }
 0x276   :  { %1229 = vsyncpa [#allocation5], 1 }
 0x277   :  { %1230 = vsyncpa [#allocation8], 1 }

</bundles_post_ra>
